<compile_context>
chip_gen: v6e
topology: v6e:2x2x1
jax: 0.10.0
libtpu: 0.0.40
codegen_flags: <defaults>
</compile_context>

<pallas_src>
import jax
import jax.numpy as jnp
import numpy as np
from jax.experimental import pallas as pl
from jax.experimental.pallas import tpu as pltpu

SIGMA = 25.0
EPS = 1e-5
C = 3                          # image channels (RGB use case of the module)
N_VAR = C * (C + 1) // 2       # 6
C_OUT = C + N_VAR              # 9  (mean channels + var channels)
S2 = SIGMA * SIGMA + EPS       # baked-in constant


def _loglike_kernel(out_ref, tr_ref, lik_ref):
    """Per-pixel negative log-likelihood (C=3, closed-form 3x3 inverse).

    out_ref: (1, 9, BP)  channels [0:3] = mean, [3:9] = var entries
    tr_ref:  (1, 3, BP)
    lik_ref: (1, 1, BP)
    """
    o = out_ref[0]          # (9, BP)
    t = tr_ref[0]           # (3, BP)

    # residual d = truth - mean  (kept as (1, BP) lane-dense slabs)
    d0 = t[0:1, :] - o[0:1, :]
    d1 = t[1:2, :] - o[1:2, :]
    d2 = t[2:3, :] - o[2:3, :]

    v0 = o[3:4, :]
    v1 = o[4:5, :]
    v2 = o[5:6, :]
    v3 = o[6:7, :]
    v4 = o[7:8, :]
    v5 = o[8:9, :]

    # A (the torch 'ax' matrix, row-major, per pixel):
    #   [[v0, v1, v2],
    #    [v3, v4,  0],
    #    [v5,  0,  0]]
    # V = A^T A + (sigma^2 + eps) * I   (symmetric 3x3)
    V00 = v0 * v0 + v3 * v3 + v5 * v5 + S2
    V01 = v0 * v1 + v3 * v4
    V02 = v0 * v2
    V11 = v1 * v1 + v4 * v4 + S2
    V12 = v1 * v2
    V22 = v2 * v2 + S2

    # cofactors (adjugate of symmetric V)
    c00 = V11 * V22 - V12 * V12
    c01 = V02 * V12 - V01 * V22
    c02 = V01 * V12 - V02 * V11
    c11 = V00 * V22 - V02 * V02
    c12 = V01 * V02 - V00 * V12
    c22 = V00 * V11 - V01 * V01

    det = V00 * c00 + V01 * c01 + V02 * c02          # > 0 (SPD)

    quad = (c00 * d0 * d0 + c11 * d1 * d1 + c22 * d2 * d2
            + 2.0 * (c01 * d0 * d1 + c02 * d0 * d2 + c12 * d1 * d2))

    lik = 0.5 * quad / det + 0.5 * jnp.log(det)
    lik_ref[0] = lik                                  # (1, BP), lane-dense store


def loss_function(output, truth, mode="loglike", sigma=SIGMA, *,
                  pixel_block=8192):
    """JAX/Pallas equivalent of loss_function.forward."""
    if mode == "mse":
        # Trivial reduction: plain JAX (no kernel needed).
        return jnp.sum((output - truth) ** 2) / (truth.shape[0] * 2)
    if mode == "l1":
        return jnp.mean(jnp.abs(output - truth))

    # ---- mode == 'loglike' (Pallas kernel path) ----
    N, Cc, H, W = truth.shape
    assert Cc == C, "Pallas loglike kernel is specialized for C=3"
    assert output.shape == (N, C_OUT, H, W)

    HW = H * W
    out_f = output.reshape(N, C_OUT, HW).astype(jnp.float32)
    tr_f = truth.reshape(N, C, HW).astype(jnp.float32)

    # Lane-dense pixel block (multiple of 128), whole-image when it fits.
    BP = max(128, min(pixel_block, pl.next_power_of_2(HW)))
    HW_pad = pl.cdiv(HW, BP) * BP
    if HW_pad != HW:
        pad = HW_pad - HW
        out_f = jnp.pad(out_f, ((0, 0), (0, 0), (0, pad)))
        tr_f = jnp.pad(tr_f, ((0, 0), (0, 0), (0, pad)))

    grid = (N, HW_pad // BP)

    lik = pl.pallas_call(
        _loglike_kernel,
        out_shape=jax.ShapeDtypeStruct((N, 1, HW_pad), jnp.float32),
        grid_spec=pltpu.PrefetchScalarGridSpec(
            num_scalar_prefetch=0,
            grid=grid,
            in_specs=[
                pl.BlockSpec((1, C_OUT, BP), lambda n, p: (n, 0, p)),
                pl.BlockSpec((1, C, BP), lambda n, p: (n, 0, p)),
            ],
            out_specs=pl.BlockSpec((1, 1, BP), lambda n, p: (n, 0, p)),
        ),
        compiler_params=pltpu.CompilerParams(
            dimension_semantics=("parallel", "parallel")),
    )(out_f, tr_f)

    lik = lik[:, 0, :HW]                               # (N, H*W) real pixels
    # Final scalar reduction (cheap) done in plain JAX.
    return jnp.mean(jnp.mean(lik, axis=1)) - 0.1 * sigma


def _reference_loglike(output, truth, sigma=SIGMA):
    """Pure-JAX reference mirroring the PyTorch forward (loglike mode)."""
    eps = 1e-5
    N, Cc, H, W = truth.shape
    mean = jnp.transpose(output[:, :Cc], (0, 2, 3, 1)).reshape(N, H, W, Cc, 1)
    nvar = Cc * (Cc + 1) // 2
    var = jnp.transpose(output[:, Cc:Cc + nvar], (0, 2, 3, 1))
    tr = jnp.transpose(truth, (0, 2, 3, 1)).reshape(N, H, W, Cc, 1)

    ax = jnp.zeros((N, H, W, Cc * Cc), jnp.float32)
    idx1 = 0
    for i in range(Cc):
        idx2 = idx1 + Cc - i
        ax = ax.at[..., i * Cc:i * Cc + Cc - i].set(var[..., idx1:idx2])
        idx1 = idx2
    ax = ax.reshape(N, H, W, Cc, Cc)

    I = jnp.broadcast_to(jnp.eye(Cc, dtype=jnp.float32), (N, H, W, Cc, Cc))
    variance = jnp.matmul(jnp.swapaxes(ax, 3, 4), ax) + (sigma ** 2 + eps) * I

    diff = tr - mean
    inv = jnp.linalg.inv(variance)
    lik = 0.5 * jnp.matmul(jnp.matmul(jnp.swapaxes(diff, 3, 4), inv), diff)
    lik = lik.reshape(N, H, W)
    _, logdet = jnp.linalg.slogdet(variance)
    lik = lik + 0.5 * logdet
    return jnp.mean(jnp.mean(lik, axis=(1, 2)) - 0.1 * sigma)


if __name__ == "__main__":
    key = jax.random.PRNGKey(0)
    k1, k2 = jax.random.split(key)
    N, H, W = 2, 16, 16
    output = jax.random.normal(k1, (N, C_OUT, H, W), dtype=jnp.float32)
    truth = jax.random.normal(k2, (N, C, H, W), dtype=jnp.float32)

    loss = loss_function(output, truth)          # default mode='loglike'
    loss = jax.block_until_ready(loss)

    ref = _reference_loglike(output, truth)
    np.testing.assert_allclose(np.asarray(loss), np.asarray(ref),
                               rtol=1e-4, atol=1e-4)
    print("KERNEL_OK")
</pallas_src>

<mosaic_0001>
module attributes {stable_mosaic.version = 11 : i64} {
  func.func @_loglike_kernel(%arg0: i32, %arg1: i32, %arg2: memref<1x9x256xf32, #tpu.memory_space<vmem>>, %arg3: memref<1x3x256xf32, #tpu.memory_space<vmem>>, %arg4: memref<1x1x256xf32, #tpu.memory_space<vmem>>) attributes {dimension_semantics = [#tpu.dimension_semantics<parallel>, #tpu.dimension_semantics<parallel>], iteration_bounds = array<i64: 2, 1>, scalar_prefetch = 0 : i64, scratch_operands = 0 : i64, tpu.core_type = #tpu.core_type<tc>, window_params = [{transform_indices = @transform_0, window_bounds = array<i64: 1, 9, 256>}, {transform_indices = @transform_1, window_bounds = array<i64: 1, 3, 256>}, {transform_indices = @transform_2, window_bounds = array<i64: 1, 1, 256>}]} {
    %c0 = arith.constant 0 : index
    %c0_0 = arith.constant 0 : index
    %c0_1 = arith.constant 0 : index
    %0 = vector.load %arg2[%c0, %c0_0, %c0_1] : memref<1x9x256xf32, #tpu.memory_space<vmem>>, vector<1x9x256xf32>
    %1 = vector.shape_cast %0 : vector<1x9x256xf32> to vector<9x256xf32>
    %c0_2 = arith.constant 0 : index
    %c0_3 = arith.constant 0 : index
    %c0_4 = arith.constant 0 : index
    %2 = vector.load %arg3[%c0_2, %c0_3, %c0_4] : memref<1x3x256xf32, #tpu.memory_space<vmem>>, vector<1x3x256xf32>
    %3 = vector.shape_cast %2 : vector<1x3x256xf32> to vector<3x256xf32>
    %4 = vector.extract_strided_slice %3 {offsets = [0, 0], sizes = [1, 256], strides = [1, 1]} : vector<3x256xf32> to vector<1x256xf32>
    %5 = vector.extract_strided_slice %1 {offsets = [0, 0], sizes = [1, 256], strides = [1, 1]} : vector<9x256xf32> to vector<1x256xf32>
    %6 = arith.subf %4, %5 : vector<1x256xf32>
    %7 = vector.extract_strided_slice %3 {offsets = [1, 0], sizes = [1, 256], strides = [1, 1]} : vector<3x256xf32> to vector<1x256xf32>
    %8 = vector.extract_strided_slice %1 {offsets = [1, 0], sizes = [1, 256], strides = [1, 1]} : vector<9x256xf32> to vector<1x256xf32>
    %9 = arith.subf %7, %8 : vector<1x256xf32>
    %10 = vector.extract_strided_slice %3 {offsets = [2, 0], sizes = [1, 256], strides = [1, 1]} : vector<3x256xf32> to vector<1x256xf32>
    %11 = vector.extract_strided_slice %1 {offsets = [2, 0], sizes = [1, 256], strides = [1, 1]} : vector<9x256xf32> to vector<1x256xf32>
    %12 = arith.subf %10, %11 : vector<1x256xf32>
    %13 = vector.extract_strided_slice %1 {offsets = [3, 0], sizes = [1, 256], strides = [1, 1]} : vector<9x256xf32> to vector<1x256xf32>
    %14 = vector.extract_strided_slice %1 {offsets = [4, 0], sizes = [1, 256], strides = [1, 1]} : vector<9x256xf32> to vector<1x256xf32>
    %15 = vector.extract_strided_slice %1 {offsets = [5, 0], sizes = [1, 256], strides = [1, 1]} : vector<9x256xf32> to vector<1x256xf32>
    %16 = vector.extract_strided_slice %1 {offsets = [6, 0], sizes = [1, 256], strides = [1, 1]} : vector<9x256xf32> to vector<1x256xf32>
    %17 = vector.extract_strided_slice %1 {offsets = [7, 0], sizes = [1, 256], strides = [1, 1]} : vector<9x256xf32> to vector<1x256xf32>
    %18 = vector.extract_strided_slice %1 {offsets = [8, 0], sizes = [1, 256], strides = [1, 1]} : vector<9x256xf32> to vector<1x256xf32>
    %19 = arith.mulf %13, %13 : vector<1x256xf32>
    %20 = arith.mulf %16, %16 : vector<1x256xf32>
    %21 = arith.addf %19, %20 : vector<1x256xf32>
    %22 = arith.mulf %18, %18 : vector<1x256xf32>
    %23 = arith.addf %21, %22 : vector<1x256xf32>
    %cst = arith.constant 6.250000e+02 : f32
    %24 = vector.broadcast %cst : f32 to vector<1x256xf32>
    %25 = arith.addf %23, %24 : vector<1x256xf32>
    %26 = arith.mulf %13, %14 : vector<1x256xf32>
    %27 = arith.mulf %16, %17 : vector<1x256xf32>
    %28 = arith.addf %26, %27 : vector<1x256xf32>
    %29 = arith.mulf %13, %15 : vector<1x256xf32>
    %30 = arith.mulf %14, %14 : vector<1x256xf32>
    %31 = arith.mulf %17, %17 : vector<1x256xf32>
    %32 = arith.addf %30, %31 : vector<1x256xf32>
    %cst_5 = arith.constant 6.250000e+02 : f32
    %33 = vector.broadcast %cst_5 : f32 to vector<1x256xf32>
    %34 = arith.addf %32, %33 : vector<1x256xf32>
    %35 = arith.mulf %14, %15 : vector<1x256xf32>
    %36 = arith.mulf %15, %15 : vector<1x256xf32>
    %cst_6 = arith.constant 6.250000e+02 : f32
    %37 = vector.broadcast %cst_6 : f32 to vector<1x256xf32>
    %38 = arith.addf %36, %37 : vector<1x256xf32>
    %39 = arith.mulf %34, %38 : vector<1x256xf32>
    %40 = arith.mulf %35, %35 : vector<1x256xf32>
    %41 = arith.subf %39, %40 : vector<1x256xf32>
    %42 = arith.mulf %29, %35 : vector<1x256xf32>
    %43 = arith.mulf %28, %38 : vector<1x256xf32>
    %44 = arith.subf %42, %43 : vector<1x256xf32>
    %45 = arith.mulf %28, %35 : vector<1x256xf32>
    %46 = arith.mulf %29, %34 : vector<1x256xf32>
    %47 = arith.subf %45, %46 : vector<1x256xf32>
    %48 = arith.mulf %25, %38 : vector<1x256xf32>
    %49 = arith.mulf %29, %29 : vector<1x256xf32>
    %50 = arith.subf %48, %49 : vector<1x256xf32>
    %51 = arith.mulf %28, %29 : vector<1x256xf32>
    %52 = arith.mulf %25, %35 : vector<1x256xf32>
    %53 = arith.subf %51, %52 : vector<1x256xf32>
    %54 = arith.mulf %25, %34 : vector<1x256xf32>
    %55 = arith.mulf %28, %28 : vector<1x256xf32>
    %56 = arith.subf %54, %55 : vector<1x256xf32>
    %57 = arith.mulf %25, %41 : vector<1x256xf32>
    %58 = arith.mulf %28, %44 : vector<1x256xf32>
    %59 = arith.addf %57, %58 : vector<1x256xf32>
    %60 = arith.mulf %29, %47 : vector<1x256xf32>
    %61 = arith.addf %59, %60 : vector<1x256xf32>
    %62 = arith.mulf %41, %6 : vector<1x256xf32>
    %63 = arith.mulf %62, %6 : vector<1x256xf32>
    %64 = arith.mulf %50, %9 : vector<1x256xf32>
    %65 = arith.mulf %64, %9 : vector<1x256xf32>
    %66 = arith.addf %63, %65 : vector<1x256xf32>
    %67 = arith.mulf %56, %12 : vector<1x256xf32>
    %68 = arith.mulf %67, %12 : vector<1x256xf32>
    %69 = arith.addf %66, %68 : vector<1x256xf32>
    %70 = arith.mulf %44, %6 : vector<1x256xf32>
    %71 = arith.mulf %70, %9 : vector<1x256xf32>
    %72 = arith.mulf %47, %6 : vector<1x256xf32>
    %73 = arith.mulf %72, %12 : vector<1x256xf32>
    %74 = arith.addf %71, %73 : vector<1x256xf32>
    %75 = arith.mulf %53, %9 : vector<1x256xf32>
    %76 = arith.mulf %75, %12 : vector<1x256xf32>
    %77 = arith.addf %74, %76 : vector<1x256xf32>
    %cst_7 = arith.constant 2.000000e+00 : f32
    %78 = vector.broadcast %cst_7 : f32 to vector<1x256xf32>
    %79 = arith.mulf %78, %77 : vector<1x256xf32>
    %80 = arith.addf %69, %79 : vector<1x256xf32>
    %cst_8 = arith.constant 5.000000e-01 : f32
    %81 = vector.broadcast %cst_8 : f32 to vector<1x256xf32>
    %82 = arith.mulf %81, %80 : vector<1x256xf32>
    %83 = arith.divf %82, %61 : vector<1x256xf32>
    %84 = math.log %61 : vector<1x256xf32>
    %cst_9 = arith.constant 5.000000e-01 : f32
    %85 = vector.broadcast %cst_9 : f32 to vector<1x256xf32>
    %86 = arith.mulf %85, %84 : vector<1x256xf32>
    %87 = arith.addf %83, %86 : vector<1x256xf32>
    %c0_10 = arith.constant 0 : index
    %c0_11 = arith.constant 0 : index
    %c0_12 = arith.constant 0 : index
    %88 = vector.load %arg4[%c0_10, %c0_11, %c0_12] : memref<1x1x256xf32, #tpu.memory_space<vmem>>, vector<1x1x256xf32>
    %89 = vector.shape_cast %88 : vector<1x1x256xf32> to vector<1x256xf32>
    %90 = vector.shape_cast %87 : vector<1x256xf32> to vector<1x1x256xf32>
    tpu.vector_store %arg4[%c0_10, %c0_11, %c0_12], %90 {strides = array<i32>} : memref<1x1x256xf32, #tpu.memory_space<vmem>>, vector<1x1x256xf32>,
    return
  }
  func.func @transform_0(%arg0: i32, %arg1: i32) -> (i32, i32, i32) {
    %c0_i32 = arith.constant 0 : i32
    %c0_i32_0 = arith.constant 0 : i32
    return %arg0, %c0_i32, %arg1 : i32, i32, i32
  }
  func.func @transform_1(%arg0: i32, %arg1: i32) -> (i32, i32, i32) {
    %c0_i32 = arith.constant 0 : i32
    %c0_i32_0 = arith.constant 0 : i32
    return %arg0, %c0_i32, %arg1 : i32, i32, i32
  }
  func.func @transform_2(%arg0: i32, %arg1: i32) -> (i32, i32, i32) {
    %c0_i32 = arith.constant 0 : i32
    %c0_i32_0 = arith.constant 0 : i32
    return %arg0, %c0_i32, %arg1 : i32, i32, i32
  }
}

</mosaic_0001>

<bundles_post_ra>
// kernel: tpu_custom_call.1
= control target key start
LH: loop header
LB: loop body
LE: loop exit
PB: predicated region body
PF: predicated region fallthrough
CT: control target
= control target key end

     0   :  { %7 = vsyncpa [#allocation3], 0  ;;  %s919_s0 = inlined_call_operand.vmem [shape: f32[2,9,256], index: 0, kind: input, shape index: {}]   ;;  %s920_s1 = inlined_call_operand.vmem [shape: f32[2,3,256], index: 1, kind: input, shape index: {}]   ;;  %s921_s2 = inlined_call_operand.hbm [shape: f32[2,1,256], index: 2, kind: output, shape index: {}]  }
   0x1   :  { %9 = vsyncpa [#allocation3 + $0x1], 0  ;;  %s760_s9 = smov 0   ;;  %s762_s10 = smov 0  }
   0x2   :  { %s764_s11 = smov 0   ;;  %s766_s12 = smov 0  }
   0x3   :  { %s768_s13 = smov 0   ;;  %s770_s14 = smov 0  }
   0x4 LB: > { %s582_s15 = sadd.s32 4294967295, %s741_s14   ;;  %s583_s16 = sadd.s32 4294967294, %s741_s14   ;;  %s741_s14 = sphi %s770_s14, %s15_s14   ;;  %s737_s13 = sphi %s768_s13, %s928_s13   ;;  %s733_s12 = sphi %s766_s12, %s927_s12   ;;  %s729_s11 = sphi %s764_s11, %s926_s11   ;;  %s725_s10 = sphi %s762_s10, %s925_s10   ;;  %s721_s9 = sphi %s760_s9, %s924_s9  }
   0x5   : > { %s27_s17 = sadd.s32 1, %s737_s13  ;;  %s92_s18 = sadd.s32 1, %s729_s11 }
   0x6   : > { %p29_p0 = scmp.ge.s32.totalorder %s27_s17, 2  ;;  %p102_p1 = scmp.ne.s32.totalorder %s729_s11, %s725_s10 }
   0x7   : > { %p103_p2 = scmp.eq.s32.totalorder %s582_s15, 1  ;;  %p108_p3 = scmp.ne.s32.totalorder %s725_s10, %s721_s9 }
   0x8   : > { %s930_s17 = smov (%p29_p0, %s27_s17), 0  ;;  %p109_p5 = scmp.eq.s32.totalorder %s583_s16, 1 }
   0x9   : > { %p800_p4 = por %p103_p2, %p102_p1  ;;  %s87_s20 = ssub.s32 %s737_s13, %s930_s17 }
   0xa   : > { %p586_p6 = scmp.ge.s32.totalorder %s741_s14, 1  ;;  %p90_p7 = scmp.eq.s32.totalorder %s87_s20, 0 }
   0xb   : > { %p807_p8 = por %p109_p5, %p108_p3  ;;  %p153_p9 = scmp.lt.s32.totalorder %s741_s14, 3 }
   0xc   : > { %s813_s22 = scalar_select %p90_p7, %s729_s11, %s92_s18  }
   0xd   : > { %p154_p10 = pnand %p586_p6, %p153_p9 }
   0xe   : > { %p189_p11 = scmp.lt.s32.totalorder (!%p154_p10), %s733_s12, 1  ;;  %s185_s4 = sand.u32 (!%p154_p10), 1, %s725_s10  }
   0xf   : > { %157 = sbr.rel (%p154_p10) target bundleno = 101 (0x65), region = 28  ;;  %s587_s5 = sshll.u32 (!%p154_p10), %s185_s4, 1 }
  0x10   : > { %s599_s6 = sshll.u32 (!%p154_p10), %s733_s12, 5  ;;  %s187_s7 = scalar_lea.vmem (!%p154_p10), [#allocation2], %s587_s5 }
  0x11   : > { %s488_s8 = sshll.u32 (!%p154_p10), %s187_s7, 4  ;;  %s486_s18 = scalar_lea.hbm (!%p154_p10), %s921_s2, %s599_s6  ;;  %s489_s8 = int_to_ptr.vmem [resolvable:$true] %s488_s8 }
  0x12   : > { %s472_s20 = scalar_lea.sflag (!%p154_p10), [#allocation3], %s185_s4 }
  0x14   : > { %v338_v0 = vlaneseq  ;;  %s817_s23 = scalar_select %p189_p11, %s733_s12, 1 }
  0x16   : > { %v820_v1 = vshrl.u32 %v338_v0, 7  ;;  %s597_s24 = sshll.u32 %s817_s23, 5  ;;  %s598_s28 = sshll.u32 %s817_s23, 3  ;;  %vm468_vm0 = vcmp.lt.s32.totalorder %v338_v0, 256 }
  0x17   : > { %s196_s27 = scalar_lea.vmem %s919_s0, %s597_s24  ;;  %s206_s3 = scalar_lea.vmem %s920_s1, %s598_s28 }
  0x18   : > { %v826_v2 = vld [vmem:[%s196_s27] sm:$0xff]  ;;  %v828_v3 = vld [vmem:[%s196_s27 + $0x8] sm:$0xff]  ;;  %v211_v4 = vld [vmem:[%s196_s27 + $0x10] sm:$0x1]  ;;  %v340_v5 = vsub.s32 0, %v820_v1  ;;  %v344_v10 = vsub.s32 4, %v820_v1 }
  0x19   : > { %v212_v6 = vld [vmem:[%s196_s27 + $0x18] sm:$0x1]  ;;  %v219_v7 = vmul.f32 %v826_v2, %v826_v2  ;;  %v220_v8 = vmul.f32 %v828_v3, %v828_v3  ;;  %v229_v9 = vmul.f32 %v211_v4, %v211_v4  ;;  %v241_v12 = vrot.slane %v826_v2, 1  ;;  %v213_v59 = vld [vmem:[%s206_s3] sm:$0x77]  ;;  %s665_s23 = scalar_lea.vmem %s489_s8, 32 }
  0x1a   : > { %v230_v11 = vmul.f32 %v212_v6, %v212_v6  ;;  %v242_v13 = vrot.slane %v828_v3, 1  ;;  %v354_v14 = vsub.s32 1, %v820_v1  ;;  %v255_v18 = vrot.slane %v826_v2, 2  ;;  %p666_p12 = scmp.ne.s32.totalorder %s489_s8, %s665_s23  ;;  %s744_s24 = smov [#allocation2]  }
  0x1b   : > { %v223_v15 = vrot.slane %v219_v7, 3  ;;  %v224_v16 = vrot.slane %v220_v8, 3  ;;  %v233_v17 = vrot.slane %v229_v9, 5  ;;  %v245_v20 = vmul.f32 %v241_v12, %v826_v2  ;;  %s669_s12 = sshll.u32 %s744_s24, 4  ;;  %s670_s12 = int_to_ptr.vmem [resolvable:$false] %s669_s12 }
  0x1c   : > { %v234_v19 = vrot.slane %v230_v11, 5  ;;  %v246_v21 = vmul.f32 %v242_v13, %v828_v3  ;;  %v256_v22 = vrot.slane %v828_v3, 2  ;;  %v263_v25 = vadd.f32 625.0, %v219_v7  ;;  %p667_p13 = pnand %p666_p12, %p800_p4  ;;  %s671_s25 = scalar_lea.vmem %s670_s12, 64 }
  0x1d   : > { %v227_v23 = vadd.f32 %v223_v15, %v219_v7  ;;  %v228_v24 = vadd.f32 %v224_v16, %v220_v8  ;;  %v358_v26 = vsub.s32 5, %v820_v1  ;;  %v216_v27 = vcombine.low %v826_v2, %v828_v3  ;;  %p672_p1 = scmp.lt.s32.totalorder %s489_s8, %s670_s12  ;;  %p673_p2 = scmp.lt.s32.totalorder %s671_s25, %s665_s23 }
  0x1e   : > { %v249_v28 = vrot.slane %v245_v20, 3  ;;  %v250_v29 = vrot.slane %v246_v21, 3  ;;  %v264_v30 = vadd.f32 625.0, %v220_v8  ;;  %v847_v31 = vmul.f32 %v255_v18, %v826_v2  ;;  %p668_p0 = pneg %p667_p13 }
  0x1f   : > { %v850_v32 = vmul.f32 %v256_v22, %v828_v3  ;;  %v261_v33 = vadd.f32 625.0, %v227_v23  ;;  %v262_v34 = vadd.f32 625.0, %v228_v24  ;;  %v237_v35 = vadd.f32 %v233_v17, %v227_v23  ;;  %p674_p3 = por %p673_p2, %p672_p1 }
  0x20   : > { %v238_v36 = vadd.f32 %v234_v19, %v228_v24  ;;  %v267_v37 = vrot.slane %v263_v25, 1  ;;  %v268_v38 = vrot.slane %v264_v30, 1  ;;  %v253_v39 = vadd.f32 %v249_v28, %v245_v20 }
  0x21   : > { %v254_v40 = vadd.f32 %v250_v29, %v246_v21  ;;  %v273_v41 = vmul.f32 %v245_v20, %v245_v20  ;;  %v274_v42 = vmul.f32 %v246_v21, %v246_v21  ;;  %v277_v45 = vrot.slane %v245_v20, 1  ;;  %p675_p5 = pnand %p674_p3, %p668_p0 }
  0x22   : > { %v271_v43 = vmul.f32 %v267_v37, %v261_v33  ;;  %v272_v44 = vmul.f32 %v268_v38, %v262_v34  ;;  %v278_v46 = vrot.slane %v246_v21, 1  ;;  %v283_v47 = vrot.slane %v263_v25, 2 }
  0x23   : > { %v284_v48 = vrot.slane %v264_v30, 2  ;;  %v295_v49 = vrot.slane %v261_v33, 1  ;;  %v296_v50 = vrot.slane %v262_v34, 1  ;;  %v239_v51 = vadd.f32 625.0, %v237_v35 }
  0x24   : > { %v240_v52 = vadd.f32 625.0, %v238_v36  ;;  %v281_v53 = vmul.f32 %v277_v45, %v847_v31  ;;  %v282_v54 = vmul.f32 %v278_v46, %v850_v32  ;;  %v287_v55 = vmul.f32 %v283_v47, %v253_v39 }
  0x25   : > { %v288_v56 = vmul.f32 %v284_v48, %v254_v40  ;;  %v291_v57 = vmul.f32 %v277_v45, %v253_v39  ;;  %v292_v58 = vmul.f32 %v278_v46, %v254_v40  ;;  %v275_v60 = vsub.f32 %v271_v43, %v273_v41 }
  0x26   : > { %v299_v61 = vmul.f32 %v295_v49, %v847_v31  ;;  %v300_v62 = vmul.f32 %v296_v50, %v850_v32  ;;  %v303_v63 = vmul.f32 %v283_v47, %v239_v51  ;;  %v276_v2 = vsub.f32 %v272_v44, %v274_v42 }
  0x27   : > { %v304_v3 = vmul.f32 %v284_v48, %v240_v52  ;;  %v305_v4 = vmul.f32 %v847_v31, %v847_v31  ;;  %v306_v6 = vmul.f32 %v850_v32, %v850_v32  ;;  %v289_v7 = vsub.f32 %v281_v53, %v287_v55 }
  0x28   : > { %v290_v8 = vsub.f32 %v282_v54, %v288_v56  ;;  %v376_v9 = vsub.s32 2, %v820_v1  ;;  %v380_v11 = vsub.s32 6, %v820_v1  ;;  %v218_v12 = vsub.f32 %v213_v59, %v216_v27 }
  0x29   : > { %v301_v13 = vsub.f32 %v291_v57, %v299_v61  ;;  %v302_v15 = vsub.f32 %v292_v58, %v300_v62  ;;  %v309_v16 = vmul.f32 %v847_v31, %v253_v39  ;;  %v307_v17 = vsub.f32 %v303_v63, %v305_v4 }
  0x2a   : > { %v310_v18 = vmul.f32 %v850_v32, %v254_v40  ;;  %v315_v19 = vmul.f32 %v295_v49, %v239_v51  ;;  %v317_v20 = vmul.f32 %v253_v39, %v253_v39  ;;  %v308_v21 = vsub.f32 %v304_v3, %v306_v6 }
  0x2b   : > { %v311_v22 = vmul.f32 %v277_v45, %v239_v51  ;;  %v323_v23 = vrot.slane %v275_v60, 1  ;;  %v324_v24 = vrot.slane %v276_v2, 1  ;;  %v316_v25 = vmul.f32 %v296_v50, %v240_v52 }
  0x2c   : > { %v318_v28 = vmul.f32 %v254_v40, %v254_v40  ;;  %v329_v29 = vmul.f32 %v289_v7, %v253_v39  ;;  %v330_v30 = vmul.f32 %v290_v8, %v254_v40  ;;  %v312_v33 = vmul.f32 %v278_v46, %v240_v52 }
  0x2d   : > { %v319_v34 = vsub.f32 %v315_v19, %v317_v20  ;;  %v327_v27 = vmul.f32 %v323_v23, %v239_v51  ;;  %v328_v35 = vmul.f32 %v324_v24, %v240_v52  ;;  %v333_v36 = vmul.f32 %v301_v13, %v847_v31 }
  0x2e   : > { %v334_v37 = vmul.f32 %v302_v15, %v850_v32  ;;  %v355_v38 = vrot.slane %v218_v12, %v354_v14  ;;  %v359_v41 = vrot.slane %v218_v12, %v358_v26  ;;  %v341_v39 = vrot.slane %v218_v12, %v340_v5 }
  0x2f   : > { %v331_v42 = vadd.f32 %v329_v29, %v327_v27  ;;  %v332_v43 = vadd.f32 %v330_v30, %v328_v35  ;;  %v345_v40 = vrot.slane %v218_v12, %v344_v10  ;;  %v320_v44 = vsub.f32 %v316_v25, %v318_v28 }
  0x30   : > { %v362_v45 = vmul.f32 %v355_v38, %v307_v17  ;;  %v363_v46 = vmul.f32 %v359_v41, %v308_v21  ;;  %v377_v31 = vrot.slane %v218_v12, %v376_v9  ;;  %v313_v47 = vsub.f32 %v309_v16, %v311_v22 }
  0x31   : > { %v348_v32 = vmul.f32 %v341_v39, %v275_v60  ;;  %v349_v48 = vmul.f32 %v345_v40, %v276_v2  ;;  %v314_v49 = vsub.f32 %v310_v18, %v312_v33  ;;  %v381_v50 = vrot.slane %v218_v12, %v380_v11 }
  0x32   : > { %v364_v14 = vmul.f32 %v362_v45, %v355_v38  ;;  %v384_v51 = vmul.f32 %v377_v31, %v319_v34  ;;  %v335_v26 = vadd.f32 %v333_v36, %v331_v42  ;;  %v336_v52 = vadd.f32 %v334_v37, %v332_v43 }
  0x33   : > { %v396_v53 = vmul.f32 %v341_v39, %v289_v7  ;;  %v397_v54 = vmul.f32 %v345_v40, %v290_v8  ;;  %v365_v55 = vmul.f32 %v363_v46, %v359_v41  ;;  %v385_v5 = vmul.f32 %v381_v50, %v320_v44 }
  0x34   : > { %v400_v56 = vmul.f32 %v341_v39, %v301_v13  ;;  %v401_v57 = vmul.f32 %v345_v40, %v302_v15  ;;  %v350_v10 = vmul.f32 %v348_v32, %v341_v39  ;;  %v351_v58 = vmul.f32 %v349_v48, %v345_v40 }
  0x35   : > { %v398_v59 = vmul.f32 %v396_v53, %v355_v38  ;;  %v399_v61 = vmul.f32 %v397_v54, %v359_v41  ;;  %v368_v62 = vrot.slane %v364_v14, 7  ;;  %v386_v63 = vmul.f32 %v384_v51, %v377_v31 }
  0x36   : > { %v402_v60 = vmul.f32 %v400_v56, %v377_v31  ;;  %v403_v2 = vmul.f32 %v401_v57, %v381_v50  ;;  %v406_v3 = vmul.f32 %v355_v38, %v313_v47  ;;  %v407_v4 = vmul.f32 %v359_v41, %v314_v49 }
  0x37   : > { %v426_v6 = vrot.slane %v335_v26, 7  ;;  %v427_v9 = vrot.slane %v336_v52, 7  ;;  %v369_v11 = vrot.slane %v365_v55, 7  ;;  %v387_v12 = vmul.f32 %v385_v5, %v381_v50 }
  0x38   : > { %v404_v7 = vadd.f32 %v402_v60, %v398_v59  ;;  %v405_v8 = vadd.f32 %v403_v2, %v399_v61  ;;  %v408_v16 = vmul.f32 %v406_v3, %v377_v31  ;;  %v409_v17 = vmul.f32 %v407_v4, %v381_v50 }
  0x39   : > { %657 = vrcp.f32 %v426_v6  ;;  %v390_v13 = vrot.slane %v386_v63, 7  ;;  %v372_v15 = vadd.f32 %v368_v62, %v350_v10  ;;  %v373_v20 = vadd.f32 %v369_v11, %v351_v58 }
  0x3a   : > { %659 = vrcp.f32 %v427_v9  ;;  %v410_v18 = vadd.f32 %v408_v16, %v404_v7  ;;  %v411_v19 = vadd.f32 %v409_v17, %v405_v8  ;;  %v391_v21 = vrot.slane %v387_v12, 7 }
  0x3b   : > { %661 = vlog2.f32 %v335_v26  ;;  %v394_v24 = vadd.f32 %v390_v13, %v372_v15  ;;  %v743_v38 = vmov 1966171168  }
  0x3c   : > { %663 = vlog2.f32 %v336_v52  ;;  %v412_v22 = vmul.f32 2.0, %v410_v18  ;;  %v413_v23 = vmul.f32 2.0, %v411_v19  ;;  %v395_v28 = vadd.f32 %v391_v21, %v373_v20 }
  0x3d   : > { %v452_v41 = vunpack.c.l.s4 %v743_v38 }
  0x3e   : > { %v416_v25 = vrot.slane %v412_v22, 7  ;;  %v417_v29 = vrot.slane %v413_v23, 7 }
  0x3f   : > { %v453_v31 = vunpack.c.0.s8 %v452_v41 }
  0x40   : > { %v420_v30 = vadd.f32 %v416_v25, %v394_v24  ;;  %v421_v33 = vadd.f32 %v417_v29, %v395_v28 }
  0x41   : > { %v456_v14 = vsub.s32 %v453_v31, %v820_v1 }
  0x42   : > { %v422_v35 = vmul.f32 0.5, %v420_v30  ;;  %v423_v37 = vmul.f32 0.5, %v421_v33 }
  0x46   : > { %v658_v34 = vpop.eup %657 }
  0x47   : > { %v660_v27 = vpop.eup %659  ;;  %v431_v40 = vmul.f32 %v658_v34, %v422_v35 }
  0x48   : > { %v662_v36 = vpop.eup %661  ;;  %v433_v45 = vmul.f32 %v660_v27, %v423_v37 }
  0x49   : > { %v664_v42 = vpop.eup %663  ;;  %v435_v43 = vmul.f32 0.6931472, %v662_v36 }
  0x4a   : > { %v437_v39 = vmul.f32 0.6931472, %v664_v42 }
  0x4b   : > { %v438_v44 = vmul.f32 0.5, %v435_v43 }
  0x4c   : > { %v439_v46 = vmul.f32 0.5, %v437_v39 }
  0x4d   : > { %v442_v47 = vrot.slane %v438_v44, 7 }
  0x4e   : > { %v443_v32 = vrot.slane %v439_v46, 7 }
  0x4f   : > { %v446_v48 = vadd.f32 %v442_v47, %v431_v40 }
  0x50   : > { %v447_v49 = vadd.f32 %v443_v32, %v433_v45 }
  0x52   : > { %v450_v50 = vcombine.high %v446_v48, %v447_v49 }
  0x54   : > { %v457_v51 = vrot.slane %v450_v50, %v456_v14 }
  0x56   : > { %v464_v26 = vrot.slane %v457_v51, %v456_v14 }
  0x58   : > { %470 = vst.msk [vmem:[%s187_s7] sm:$0x3] %vm468_vm0, %v464_v26 }
  0x59   : > { %678 = shalt.err (!%p675_p5)
}
  0x5a   : > { %s679_s26 = scalar_lea.hbm %s486_s18, 32  ;;  %s683_s29 = scalar_lea.hbm %s921_s2, 64 }
  0x5b   : > { %p680_p6 = scmp.ne.s32.totalorder %s486_s18, %s679_s26  ;;  %p684_p10 = scmp.lt.s32.totalorder %s486_s18, %s921_s2 }
  0x5c   : > { %p685_p11 = scmp.lt.s32.totalorder %s683_s29, %s679_s26 }
  0x5d   : > { %p681_p7 = pnand %p680_p6, %p800_p4 }
  0x5e   : > { %p686_p12 = por %p685_p11, %p684_p10 }
  0x5f   : > { %p682_p9 = pneg %p681_p7 }
  0x61   : > { %p687_p13 = pnand %p686_p12, %p682_p9 }
  0x63   : > { %690 = shalt.err (!%p687_p13)
}
  0x64   : > { %600 = dma.vmem_to_hbm [thread:$0]  (%p800_p4), %s489_s8, 32, %s486_s18, %s472_s20  }
  0x65 PF: > { %p606_p0 = scmp.ge.s32.totalorder %s741_s14, 2  ;;  %s500_s4 = sand.u32 1, %s721_s9  }
  0x66   : > { %s501_s5 = scalar_lea.sflag [#allocation3], %s500_s4 }
  0x67   : > { %p603_p1 = pnand %p606_p0, %p807_p8 }
  0x69   : > { %p604_p2 = pneg %p603_p1 }
  0x6b   : > { %716 = dma.done.wait (%p604_p2), %s501_s5, 32  }
  0x6c   : > { %718 = vsyncadd (%p604_p2), %s501_s5, 4294967264  ;;  %s15_s14 = sadd.s32 1, %s741_s14   ;;  %s924_s9 = smov %s725_s10 }
  0x6d   : > { %p12_p3 = scmp.ge.s32.totalorder %s15_s14, 4   ;;  %s925_s10 = smov %s729_s11 }
  0x6e   : > { %s926_s11 = smov %s813_s22  ;;  %s927_s12 = smov %s737_s13 }
  0x6f   : > { %s928_s13 = smov %s930_s17  ;;  %14 = sbr.rel (!%p12_p3) target bundleno = 4 (0x4), region = 66 }
  0x74   :  { %506 = vsyncpa [#allocation3], 1 }
  0x75   :  { %508 = vsyncpa [#allocation3 + $0x1], 1 }

</bundles_post_ra>
